<compile_context>
chip_gen: v5e
topology: v5e:2x2
jax: 0.10.0
libtpu: 0.0.40
codegen_flags: <defaults>
</compile_context>

<pallas_src>
import math
from functools import partial

import numpy as np
import jax
import jax.numpy as jnp
from jax import lax
from jax.experimental import pallas as pl
from jax.experimental.pallas import tpu as pltpu


def _round_up(x, m):
    return ((x + m - 1) // m) * m


def _patch_embed_kernel(x_ref, w_ref, b_ref, o_ref):
    # x_ref: (TM, K) patch rows, w_ref: (K, TE), b_ref: (1, TE) f32, o_ref: (TM, TE)
    acc = jnp.dot(x_ref[...], w_ref[...], preferred_element_type=jnp.float32)
    o_ref[...] = (acc + b_ref[...]).astype(o_ref.dtype)


@partial(jax.jit,
         static_argnames=("patch_size", "stride_size", "compute_dtype", "tm", "te"))
def patch_embed_overlap(x, weight, bias, patch_size, stride_size,
                        compute_dtype=None, tm=512, te=256):
    """Overlapping patch embedding.  Returns (B, num_patches, E)."""
    B, C, H, W = x.shape
    ph, pw = patch_size
    sh, sw = stride_size
    num_y = (H - ph) // sh + 1
    num_x = (W - pw) // sw + 1
    P = num_y * num_x
    E = weight.shape[0]
    K = C * ph * pw
    M = B * P

    out_dtype = x.dtype
    if compute_dtype is None:
        compute_dtype = x.dtype

    # --- im2col via XLA patch extraction (no Python loop over patches). ---
    # Output feature dim is ordered (C, kh, kw) C-major, matching
    # weight.reshape(E, C*ph*pw).
    patches = lax.conv_general_dilated_patches(
        x, filter_shape=(ph, pw), window_strides=(sh, sw), padding="VALID",
        dimension_numbers=("NCHW", "OIHW", "NCHW"))        # (B, K, ny, nx)
    xm = patches.reshape(B, K, P).transpose(0, 2, 1).reshape(M, K)
    xm = xm.astype(compute_dtype)

    w_flat = weight.reshape(E, K).T.astype(compute_dtype)   # (K, E)
    b2 = bias.reshape(1, E).astype(jnp.float32)             # keep bias in f32

    # --- Pad E to a lane-dense multiple of the E tile (multiple of 128). ---
    TE = min(te, _round_up(E, 128))
    TE = _round_up(TE, 128)
    E_pad = _round_up(E, TE)
    if E_pad != E:
        w_flat = jnp.pad(w_flat, ((0, 0), (0, E_pad - E)))
        b2 = jnp.pad(b2, ((0, 0), (0, E_pad - E)))

    # --- Pad K to a multiple of 128 (dense lanes on the x tile / sublanes on w). ---
    K_pad = _round_up(K, 128)
    if K_pad != K:
        xm = jnp.pad(xm, ((0, 0), (0, K_pad - K)))
        w_flat = jnp.pad(w_flat, ((0, K_pad - K), (0, 0)))

    # --- Pick TM: big (default 512, multiple of 256/128/8), but don't over-pad
    #     tiny inputs. ---
    TM = min(tm, _round_up(M, 8))
    TM = _round_up(TM, 8)
    M_pad = _round_up(M, TM)
    if M_pad != M:
        xm = jnp.pad(xm, ((0, M_pad - M), (0, 0)))

    grid = (M_pad // TM, E_pad // TE)

    # VMEM budget: double-buffered x tile + w tile + bias + out tile, with slack.
    cd = jnp.dtype(compute_dtype).itemsize
    od = jnp.dtype(out_dtype).itemsize
    vmem_need = (2 * TM * K_pad * cd + 2 * K_pad * TE * cd
                 + 2 * TE * 4 + 2 * TM * TE * od)
    vmem_limit = int(min(64 * 1024 * 1024,
                         max(32 * 1024 * 1024, int(vmem_need * 1.5))))

    cost = pl.CostEstimate(
        flops=2 * M_pad * K_pad * E_pad,
        transcendentals=0,
        bytes_accessed=(M_pad * K_pad * cd + K_pad * E_pad * cd
                        + E_pad * 4 + M_pad * E_pad * od),
    )

    out = pl.pallas_call(
        _patch_embed_kernel,
        out_shape=jax.ShapeDtypeStruct((M_pad, E_pad), out_dtype),
        grid_spec=pltpu.PrefetchScalarGridSpec(
            num_scalar_prefetch=0,
            grid=grid,
            in_specs=[
                pl.BlockSpec((TM, K_pad), lambda i, j: (i, 0)),  # patch rows
                pl.BlockSpec((K_pad, TE), lambda i, j: (0, j)),  # weight slab
                pl.BlockSpec((1, TE), lambda i, j: (0, j)),      # bias slab
            ],
            out_specs=pl.BlockSpec((TM, TE), lambda i, j: (i, j)),
        ),
        compiler_params=pltpu.CompilerParams(
            dimension_semantics=("parallel", "parallel"),
            vmem_limit_bytes=vmem_limit),
        cost_estimate=cost,
    )(xm, w_flat, b2)

    return out[:M, :E].reshape(B, P, E)


if __name__ == "__main__":
    # Small shapes consistent with the module: overlapping patches
    # (patch 8, stride 4 -> num_y = num_x = (16-8)//4 + 1 = 3, 9 patches).
    B, C, H, W = 2, 4, 16, 16
    patch_size = (8, 8)
    stride_size = (4, 4)
    embed_dim = 32

    key = jax.random.PRNGKey(0)
    kx, kw, kb = jax.random.split(key, 3)
    x = jax.random.normal(kx, (B, C, H, W), dtype=jnp.float32)

    # Deterministic synthetic init mirroring the module:
    #   conv weight ~ N(0, sqrt(2 / (kh*kw*out_channels))), bias small.
    n = patch_size[0] * patch_size[1] * embed_dim
    weight = jax.random.normal(
        kw, (embed_dim, C, patch_size[0], patch_size[1]), dtype=jnp.float32
    ) * math.sqrt(2.0 / n)
    bias = jax.random.normal(kb, (embed_dim,), dtype=jnp.float32) * 0.01

    # Reference: XLA conv + flatten + transpose.
    ref = lax.conv_general_dilated(
        x, weight, window_strides=stride_size, padding="VALID",
        dimension_numbers=("NCHW", "OIHW", "NCHW"))
    ref = ref + bias.reshape(1, embed_dim, 1, 1)
    ref = ref.reshape(B, embed_dim, -1).transpose(0, 2, 1)   # (B, P, E)

    # f32 compute path (strict tolerance).
    out = jax.block_until_ready(
        patch_embed_overlap(x, weight, bias, patch_size, stride_size))
    assert out.shape == ref.shape, (out.shape, ref.shape)
    assert np.allclose(np.asarray(out), np.asarray(ref), atol=1e-4, rtol=1e-4)

    # bf16 compute path (v6e/v7x MXU fast path), relaxed tolerance.
    out_bf16 = jax.block_until_ready(
        patch_embed_overlap(x, weight, bias, patch_size, stride_size,
                            compute_dtype=jnp.bfloat16))
    assert out_bf16.shape == ref.shape
    assert np.allclose(np.asarray(out_bf16), np.asarray(ref),
                       atol=5e-2, rtol=5e-2)

    print("KERNEL_OK")
</pallas_src>

<mosaic_0001>
module attributes {stable_mosaic.version = 11 : i64} {
  func.func @_patch_embed_kernel(%arg0: i32, %arg1: i32, %arg2: memref<24x256xf32, #tpu.memory_space<vmem>>, %arg3: memref<256x128xf32, #tpu.memory_space<vmem>>, %arg4: memref<1x128xf32, #tpu.memory_space<vmem>>, %arg5: memref<24x128xf32, #tpu.memory_space<vmem>>) attributes {dimension_semantics = [#tpu.dimension_semantics<parallel>, #tpu.dimension_semantics<parallel>], iteration_bounds = array<i64: 1, 1>, scalar_prefetch = 0 : i64, scratch_operands = 0 : i64, tpu.core_type = #tpu.core_type<tc>, window_params = [{transform_indices = @transform_0, window_bounds = array<i64: 24, 256>}, {transform_indices = @transform_1, window_bounds = array<i64: 256, 128>}, {transform_indices = @transform_2, window_bounds = array<i64: 1, 128>}, {transform_indices = @transform_3, window_bounds = array<i64: 24, 128>}]} {
    %c0 = arith.constant 0 : index
    %c0_0 = arith.constant 0 : index
    %0 = vector.load %arg2[%c0, %c0_0] : memref<24x256xf32, #tpu.memory_space<vmem>>, vector<24x256xf32>
    %c0_1 = arith.constant 0 : index
    %c0_2 = arith.constant 0 : index
    %1 = vector.load %arg3[%c0_1, %c0_2] : memref<256x128xf32, #tpu.memory_space<vmem>>, vector<256x128xf32>
    %cst = arith.constant dense<0.000000e+00> : vector<24x128xf32>
    %2 = tpu.matmul %0, %1, %cst {dimension_numbers = #tpu.dot_dimension_numbers<[1], [0], [0], [1], [0, 0, 1, 1], [], []>} : vector<24x256xf32>, vector<256x128xf32>, vector<24x128xf32> -> vector<24x128xf32>
    %c0_3 = arith.constant 0 : index
    %c0_4 = arith.constant 0 : index
    %3 = vector.load %arg4[%c0_3, %c0_4] : memref<1x128xf32, #tpu.memory_space<vmem>>, vector<1x128xf32>
    %4 = vector.broadcast %3 : vector<1x128xf32> to vector<24x128xf32>
    %5 = arith.addf %2, %4 : vector<24x128xf32>
    %c0_5 = arith.constant 0 : index
    %c0_6 = arith.constant 0 : index
    %6 = vector.load %arg5[%c0_5, %c0_6] : memref<24x128xf32, #tpu.memory_space<vmem>>, vector<24x128xf32>
    tpu.vector_store %arg5[%c0_5, %c0_6], %5 {strides = array<i32>} : memref<24x128xf32, #tpu.memory_space<vmem>>, vector<24x128xf32>,
    return
  }
  func.func @transform_0(%arg0: i32, %arg1: i32) -> (i32, i32) {
    %c0_i32 = arith.constant 0 : i32
    %c0_i32_0 = arith.constant 0 : i32
    return %arg0, %c0_i32 : i32, i32
  }
  func.func @transform_1(%arg0: i32, %arg1: i32) -> (i32, i32) {
    %c0_i32 = arith.constant 0 : i32
    %c0_i32_0 = arith.constant 0 : i32
    return %c0_i32, %arg1 : i32, i32
  }
  func.func @transform_2(%arg0: i32, %arg1: i32) -> (i32, i32) {
    %c0_i32 = arith.constant 0 : i32
    %c0_i32_0 = arith.constant 0 : i32
    return %c0_i32, %arg1 : i32, i32
  }
  func.func @transform_3(%arg0: i32, %arg1: i32) -> (i32, i32) {
    %c0_i32 = arith.constant 0 : i32
    return %arg0, %arg1 : i32, i32
  }
}

</mosaic_0001>

<bundles_post_ra>
// kernel: patch_embed_overlap.1
= control target key start
LH: loop header
LB: loop body
LE: loop exit
PB: predicated region body
PF: predicated region fallthrough
CT: control target
= control target key end

     0   :  { %s294_s1 = inlined_call_operand.vmem [shape: f32[256,128], index: 1, kind: input, shape index: {}]   ;;  %s295_s2 = inlined_call_operand.vmem [shape: f32[1,128], index: 2, kind: input, shape index: {}]   ;;  %s296_s0 = inlined_call_operand.vmem [shape: f32[24,256], index: 0, kind: input, shape index: {}]   ;;  %s297_s3 = inlined_call_operand.vmem [shape: f32[24,128], index: 3, kind: output, shape index: {}]  }
   0x1   :  { %v35_v0 = vld [vmem:[%s294_s1 + $0x78] sm:$0xff]  ;;  %v34_v1 = vld [vmem:[%s294_s1 + $0x70] sm:$0xff]  ;;  %v33_v4 = vld [vmem:[%s294_s1 + $0x68] sm:$0xff] }
   0x2   :  { %v51_v2 = vld [vmem:[%s294_s1 + $0xf8] sm:$0xff]  ;;  %115 = vmatpush.msra.mxu2 %v35_v0  ;;  %v50_v3 = vld [vmem:[%s294_s1 + $0xf0] sm:$0xff]  ;;  %v49_v5 = vld [vmem:[%s294_s1 + $0xe8] sm:$0xff]  ;;  %56 = vmatpush.msra.mxu0 %v35_v0 }
   0x3   :  { %131 = vmatpush.msra.mxu3 %v51_v2  ;;  %82 = vmatpush.msra.mxu1 %v51_v2  ;;  %v32_v6 = vld [vmem:[%s294_s1 + $0x60] sm:$0xff]  ;;  %v31_v8 = vld [vmem:[%s294_s1 + $0x58] sm:$0xff]  ;;  %v30_v10 = vld [vmem:[%s294_s1 + $0x50] sm:$0xff] }
   0x4   :  { %116 = vmatpush.msra.mxu2 %v34_v1  ;;  %v48_v7 = vld [vmem:[%s294_s1 + $0xe0] sm:$0xff]  ;;  %57 = vmatpush.msra.mxu0 %v34_v1  ;;  %v47_v9 = vld [vmem:[%s294_s1 + $0xd8] sm:$0xff]  ;;  %v46_v11 = vld [vmem:[%s294_s1 + $0xd0] sm:$0xff] }
   0x5   :  { %132 = vmatpush.msra.mxu3 %v50_v3  ;;  %83 = vmatpush.msra.mxu1 %v50_v3  ;;  %v29_v12 = vld [vmem:[%s294_s1 + $0x48] sm:$0xff]  ;;  %v28_v14 = vld [vmem:[%s294_s1 + $0x40] sm:$0xff]  ;;  %v27_v16 = vld [vmem:[%s294_s1 + $0x38] sm:$0xff] }
   0x6   :  { %117 = vmatpush.msra.mxu2 %v33_v4  ;;  %58 = vmatpush.msra.mxu0 %v33_v4  ;;  %v45_v13 = vld [vmem:[%s294_s1 + $0xc8] sm:$0xff]  ;;  %v44_v15 = vld [vmem:[%s294_s1 + $0xc0] sm:$0xff]  ;;  %v43_v17 = vld [vmem:[%s294_s1 + $0xb8] sm:$0xff] }
   0x7   :  { %133 = vmatpush.msra.mxu3 %v49_v5  ;;  %84 = vmatpush.msra.mxu1 %v49_v5  ;;  %v26_v18 = vld [vmem:[%s294_s1 + $0x30] sm:$0xff]  ;;  %v25_v20 = vld [vmem:[%s294_s1 + $0x28] sm:$0xff]  ;;  %v24_v22 = vld [vmem:[%s294_s1 + $0x20] sm:$0xff] }
   0x8   :  { %118 = vmatpush.msra.mxu2 %v32_v6  ;;  %59 = vmatpush.msra.mxu0 %v32_v6  ;;  %v42_v19 = vld [vmem:[%s294_s1 + $0xb0] sm:$0xff]  ;;  %v41_v21 = vld [vmem:[%s294_s1 + $0xa8] sm:$0xff]  ;;  %v40_v23 = vld [vmem:[%s294_s1 + $0xa0] sm:$0xff] }
   0x9   :  { %134 = vmatpush.msra.mxu3 %v48_v7  ;;  %85 = vmatpush.msra.mxu1 %v48_v7  ;;  %v23_v24 = vld [vmem:[%s294_s1 + $0x18] sm:$0xff]  ;;  %v22_v26 = vld [vmem:[%s294_s1 + $0x10] sm:$0xff]  ;;  %v21_v28 = vld [vmem:[%s294_s1 + $0x8] sm:$0xff] }
   0xa   :  { %119 = vmatpush.msra.mxu2 %v31_v8  ;;  %60 = vmatpush.msra.mxu0 %v31_v8  ;;  %v39_v25 = vld [vmem:[%s294_s1 + $0x98] sm:$0xff]  ;;  %v38_v27 = vld [vmem:[%s294_s1 + $0x90] sm:$0xff]  ;;  %v37_v29 = vld [vmem:[%s294_s1 + $0x88] sm:$0xff] }
   0xb   :  { %135 = vmatpush.msra.mxu3 %v47_v9  ;;  %86 = vmatpush.msra.mxu1 %v47_v9  ;;  %v20_v30 = vld [vmem:[%s294_s1] sm:$0xff]  ;;  %v16_v32 = vld [vmem:[%s296_s0 + $0x10] sm:$0xff]  ;;  %v17_v33 = vld [vmem:[%s296_s0 + $0x18] sm:$0xff] }
   0xc   :  { %120 = vmatpush.msra.mxu2 %v30_v10  ;;  %61 = vmatpush.msra.mxu0 %v30_v10  ;;  %v36_v31 = vld [vmem:[%s294_s1 + $0x80] sm:$0xff]  ;;  %v15_v35 = vld [vmem:[%s296_s0 + $0x8] sm:$0xff] }
   0xd   :  { %136 = vmatpush.msra.mxu3 %v46_v11  ;;  %87 = vmatpush.msra.mxu1 %v46_v11  ;;  %v14_v34 = vld [vmem:[%s296_s0] sm:$0xff]  ;;  %v19_v37 = vld [vmem:[%s296_s0 + $0x28] sm:$0xff] }
   0xe   :  { %121 = vmatpush.msra.mxu2 %v29_v12  ;;  %62 = vmatpush.msra.mxu0 %v29_v12  ;;  %v18_v36 = vld [vmem:[%s296_s0 + $0x20] sm:$0xff] }
   0xf   :  { %137 = vmatpush.msra.mxu3 %v45_v13  ;;  %88 = vmatpush.msra.mxu1 %v45_v13  ;;  %v147_v38 = vld [vmem:[%s295_s2] ss:$0 sm:$0xff] }
  0x10   :  { %122 = vmatpush.msra.mxu2 %v28_v14  ;;  %63 = vmatpush.msra.mxu0 %v28_v14 }
  0x11   :  { %138 = vmatpush.msra.mxu3 %v44_v15  ;;  %89 = vmatpush.msra.mxu1 %v44_v15 }
  0x12   :  { %123 = vmatpush.msra.mxu2 %v27_v16  ;;  %64 = vmatpush.msra.mxu0 %v27_v16 }
  0x13   :  { %139 = vmatpush.msra.mxu3 %v43_v17  ;;  %90 = vmatpush.msra.mxu1 %v43_v17 }
  0x14   :  { %124 = vmatpush.msra.mxu2 %v26_v18  ;;  %65 = vmatpush.msra.mxu0 %v26_v18 }
  0x15   :  { %140 = vmatpush.msra.mxu3 %v42_v19  ;;  %91 = vmatpush.msra.mxu1 %v42_v19 }
  0x16   :  { %125 = vmatpush.msra.mxu2 %v25_v20  ;;  %66 = vmatpush.msra.mxu0 %v25_v20 }
  0x17   :  { %141 = vmatpush.msra.mxu3 %v41_v21  ;;  %92 = vmatpush.msra.mxu1 %v41_v21 }
  0x18   :  { %126 = vmatpush.msra.mxu2 %v24_v22  ;;  %67 = vmatpush.msra.mxu0 %v24_v22 }
  0x19   :  { %142 = vmatpush.msra.mxu3 %v40_v23  ;;  %93 = vmatpush.msra.mxu1 %v40_v23 }
  0x1a   :  { %127 = vmatpush.msra.mxu2 %v23_v24  ;;  %68 = vmatpush.msra.mxu0 %v23_v24 }
  0x1b   :  { %143 = vmatpush.msra.mxu3 %v39_v25  ;;  %94 = vmatpush.msra.mxu1 %v39_v25 }
  0x1c   :  { %128 = vmatpush.msra.mxu2 %v22_v26  ;;  %69 = vmatpush.msra.mxu0 %v22_v26 }
  0x1d   :  { %144 = vmatpush.msra.mxu3 %v38_v27  ;;  %95 = vmatpush.msra.mxu1 %v38_v27 }
  0x1e   :  { %129 = vmatpush.msra.mxu2 %v21_v28  ;;  %70 = vmatpush.msra.mxu0 %v21_v28 }
  0x1f   :  { %145 = vmatpush.msra.mxu3 %v37_v29  ;;  %96 = vmatpush.msra.mxu1 %v37_v29 }
  0x20   :  { %130 = vmatpush.msra.mxu2 %v20_v30  ;;  %71 = vmatpush.msra.mxu0 %v20_v30 }
  0x21   :  { %146 = vmatpush.msra.mxu3 %v36_v31  ;;  %75 = vmatmul.f32.vlgmr.msra.gmra.mxu2 %v16_v32 }
  0x22   :  { %101 = vmatmul.f32.vlgmr.msra.gmra.mxu3 %v17_v33  ;;  %97 = vmatpush.msra.mxu1 %v36_v31 }
  0x23   :  { %72 = vmatmul.f32.vlgmr.msra.gmra.mxu0 %v14_v34  ;;  %98 = vmatmul.f32.vlgmr.msra.gmra.mxu1 %v15_v35 }
  0x29   :  { %78 = vmatmul.f32.gmra.mxu2 %v18_v36 }
  0x2a   :  { %104 = vmatmul.f32.gmra.mxu3 %v19_v37 }
  0xa0   :  { %v73_v39 = vpop.f32.mrf.mxu0  ;;  %v99_v40 = vpop.f32.mrf.mxu1 }
  0xa1   :  { %v74_v41 = vadd.f32 %v147_v38, %v73_v39 }
  0xa3   :  { %v100_v42 = vadd.f32 %v99_v40, %v74_v41 }
  0xa4   :  { %v76_v43 = vpop.f32.mrf.mxu2 }
  0xa5   :  { %v102_v44 = vpop.f32.mrf.mxu3  ;;  %v77_v45 = vadd.f32 %v147_v38, %v76_v43  ;;  %108 = vst [vmem:[%s297_s3] sm:$0xff] %v100_v42 }
  0xa7   :  { %v103_v46 = vadd.f32 %v102_v44, %v77_v45 }
  0xa9   :  { %109 = vst [vmem:[%s297_s3 + $0x8] sm:$0xff] %v103_v46 }
  0xac   :  { %v79_v47 = vpop.f32.mrf.mxu2 }
  0xad   :  { %v105_v48 = vpop.f32.mrf.mxu3  ;;  %v80_v49 = vadd.f32 %v147_v38, %v79_v47 }
  0xaf   :  { %v106_v50 = vadd.f32 %v105_v48, %v80_v49 }
  0xb1   :  { %110 = vst [vmem:[%s297_s3 + $0x10] sm:$0xff] %v106_v50 }

</bundles_post_ra>
